<compile_context>
chip_gen: v6e
topology: v6e:2x2x1
jax: 0.10.0
libtpu: 0.0.40
codegen_flags: <defaults>
</compile_context>

<pallas_src>
import functools

import numpy as np
import jax
import jax.numpy as jnp
from jax import lax
from jax.experimental import pallas as pl
from jax.experimental.pallas import tpu as pltpu


def _round_up(n, m):
    return ((n + m - 1) // m) * m


def _vmem_capacity_bytes():
    try:
        return int(pltpu.get_tpu_info().vmem_capacity_bytes)
    except Exception:
        return 64 << 20  # conservative (v7x per-TensorCore)


def _default_act_dtype(weight_dtype):
    """bf16 element-wise path only where the VPU supports it (v6e / v7x)."""
    if np.dtype(weight_dtype) != np.dtype(jnp.bfloat16):
        return jnp.float32
    try:
        kind = jax.devices()[0].device_kind.lower()
    except Exception:
        return jnp.float32
    if ("v6" in kind) or ("v7" in kind):
        return jnp.bfloat16
    return jnp.float32


# --------------------------------------------------------------------------
# Kernels
# --------------------------------------------------------------------------
def _sffnn_resident_kernel(n_hidden, n_sub, act_dtype, *refs):
    """All weights VMEM-resident; batch tile split into n_sub interleaved sub-tiles."""
    if n_hidden > 0:
        (x_ref, w_in_ref, b_in_ref, w_h_ref, b_h_ref,
         w_out_ref, b_out_ref, o_ref) = refs
    else:
        x_ref, w_in_ref, b_in_ref, w_out_ref, b_out_ref, o_ref = refs
        w_h_ref = b_h_ref = None

    w_dtype = w_in_ref.dtype
    TB = x_ref.shape[0]
    sub = TB // n_sub

    def readin(xs):
        h = jnp.dot(xs.astype(w_dtype), w_in_ref[...],
                    preferred_element_type=jnp.float32)
        return jnp.maximum(h.astype(act_dtype) + b_in_ref[...], 0)

    def layer(i, h):
        hh = jnp.dot(h.astype(w_dtype), w_h_ref[i],
                     preferred_element_type=jnp.float32)
        return jnp.maximum(hh.astype(act_dtype) + b_h_ref[i], 0)

    def readout(h):
        return (jnp.dot(h.astype(w_dtype), w_out_ref[...],
                        preferred_element_type=jnp.float32) + b_out_ref[...])

    hs = [readin(x_ref[pl.ds(s * sub, sub), :]) for s in range(n_sub)]

    if n_hidden > 0:
        if n_hidden <= 8:
            # static unroll keeps the layer chain visible to the LLO scheduler
            for i in range(n_hidden):
                hs = [layer(i, h) for h in hs]
        else:
            def body(i, carry):
                return tuple(layer(i, h) for h in carry)
            hs = list(lax.fori_loop(0, n_hidden, body, tuple(hs)))

    for s in range(n_sub):
        o_ref[pl.ds(s * sub, sub), :] = readout(hs[s]).astype(o_ref.dtype)


def _sffnn_stream_kernel(act_dtype, x_ref, w_in_ref, b_in_ref, w_h_ref, b_h_ref,
                         w_out_ref, b_out_ref, o_ref, h_ref):
    """One hidden layer per grid step; activation carried in VMEM scratch."""
    w_dtype = w_in_ref.dtype
    l = pl.program_id(1)

    @pl.when(l == 0)
    def _():
        h = jnp.dot(x_ref[...].astype(w_dtype), w_in_ref[...],
                    preferred_element_type=jnp.float32)
        h_ref[...] = jnp.maximum(h.astype(act_dtype) + b_in_ref[...],
                                 0).astype(h_ref.dtype)

    hh = jnp.dot(h_ref[...].astype(w_dtype), w_h_ref[0],
                 preferred_element_type=jnp.float32)
    h_ref[...] = jnp.maximum(hh.astype(act_dtype) + b_h_ref[0],
                             0).astype(h_ref.dtype)

    @pl.when(l == pl.num_programs(1) - 1)
    def _():
        o = (jnp.dot(h_ref[...].astype(w_dtype), w_out_ref[...],
                     preferred_element_type=jnp.float32) + b_out_ref[...])
        o_ref[...] = o.astype(o_ref.dtype)


# --------------------------------------------------------------------------
# Wrappers
# --------------------------------------------------------------------------
def prepare_params(w_in, b_in, w_h, b_h, w_out, b_out,
                   weight_dtype=jnp.bfloat16, act_dtype=None):
    """Pad to lane-dense (128) feature dims and cast ONCE; reuse across calls
    so the jnp.pad / astype HBM copies are not paid on every forward pass."""
    if act_dtype is None:
        act_dtype = _default_act_dtype(weight_dtype)

    D_in, H = w_in.shape
    D_out = w_out.shape[1]
    n_hidden = int(w_h.shape[0])

    D_in_p = _round_up(D_in, 128)
    H_p = _round_up(H, 128)
    D_out_p = _round_up(D_out, 128)

    p = dict(
        D_in=D_in, H=H, D_out=D_out, n_hidden=n_hidden,
        D_in_p=D_in_p, H_p=H_p, D_out_p=D_out_p,
        weight_dtype=np.dtype(weight_dtype), act_dtype=np.dtype(act_dtype),
        w_in=jnp.pad(w_in, ((0, D_in_p - D_in), (0, H_p - H))).astype(weight_dtype),
        b_in=jnp.pad(b_in, ((0, 0), (0, H_p - H))).astype(act_dtype),
        w_out=jnp.pad(w_out, ((0, H_p - H), (0, D_out_p - D_out))).astype(weight_dtype),
        b_out=jnp.pad(b_out, ((0, 0), (0, D_out_p - D_out))).astype(jnp.float32),
    )
    if n_hidden > 0:
        p["w_h"] = jnp.pad(
            w_h, ((0, 0), (0, H_p - H), (0, H_p - H))).astype(weight_dtype)
        p["b_h"] = jnp.pad(
            b_h, ((0, 0), (0, 0), (0, H_p - H))).astype(act_dtype)
    return p


def sffnn_apply(params, x, *, stream_hidden=None):
    B, D_in = x.shape
    assert D_in == params["D_in"]
    D_in_p, H_p, D_out_p = params["D_in_p"], params["H_p"], params["D_out_p"]
    D_out, n_hidden = params["D_out"], params["n_hidden"]
    w_bytes = params["weight_dtype"].itemsize
    a_bytes = params["act_dtype"].itemsize
    act_dtype = params["act_dtype"]

    # ---- batch tiling: multiple of 8, <=512 rows/step, minimal pad waste,
    # and >=2 grid steps when possible (v7x has two TensorCores). -----------
    B_ru = _round_up(B, 8)
    nt = -(-B_ru // 512)
    TB = _round_up(-(-B_ru // nt), 8)
    if nt == 1 and TB % 16 == 0:
        nt, TB = 2, TB // 2
    B_pad = nt * TB

    x = x.astype(jnp.float32)
    if B_pad != B or D_in_p != D_in:
        x = jnp.pad(x, ((0, B_pad - B), (0, D_in_p - D_in)))

    # ---- VMEM accounting with the ACTUAL pipeline buffer counts ------------
    io_bytes = 2 * TB * (D_in_p + D_out_p) * 4              # x / out, double-buffered
    const_w_bytes = ((D_in_p * H_p + H_p * D_out_p) * w_bytes
                     + 8 * H_p * a_bytes + 8 * D_out_p * 4)  # single-buffered
    hid_w_bytes = n_hidden * (H_p * H_p * w_bytes + 8 * H_p * a_bytes)
    act_bytes = 3 * TB * H_p * 4                             # live activations + f32 temp
    resident_need = io_bytes + const_w_bytes + hid_w_bytes + act_bytes
    stream_need = (io_bytes + const_w_bytes + act_bytes + TB * H_p * a_bytes
                   + 2 * (H_p * H_p * w_bytes + 8 * H_p * a_bytes))

    vmem_cap = _vmem_capacity_bytes()
    budget = max(vmem_cap - (8 << 20), 16 << 20)

    if stream_hidden is None:
        stream_hidden = (n_hidden > 0) and (resident_need > budget)
    stream_hidden = bool(stream_hidden) and n_hidden > 0

    need = int((stream_need if stream_hidden else resident_need) * 1.25)
    cp_kwargs = {}
    if need > (16 << 20):  # above v5e's scoped default -> raise explicitly
        cp_kwargs["vmem_limit_bytes"] = min(need, budget)
    # TODO(synk): if `need` still exceeds `budget`, also tile the hidden dim.

    flops = 2 * B_pad * (D_in_p * H_p + n_hidden * H_p * H_p + H_p * D_out_p)
    bytes_hbm = (B_pad * (D_in_p + D_out_p) * 4
                 + (D_in_p * H_p + n_hidden * H_p * H_p + H_p * D_out_p) * w_bytes)
    cost = pl.CostEstimate(flops=flops, bytes_accessed=bytes_hbm,
                           transcendentals=0)

    # constant-index (VMEM-resident) operands are single-buffered; only the
    # per-step streamed operands keep multi-buffering.
    def const_spec(shape, index_map):
        return pl.BlockSpec(shape, index_map, pipeline_mode=pl.Buffered(1))

    if not stream_hidden:
        in_specs = [pl.BlockSpec((TB, D_in_p), lambda i: (i, 0)),
                    const_spec((D_in_p, H_p), lambda i: (0, 0)),
                    const_spec((1, H_p), lambda i: (0, 0))]
        operands = [x, params["w_in"], params["b_in"]]
        if n_hidden > 0:
            in_specs += [const_spec((n_hidden, H_p, H_p), lambda i: (0, 0, 0)),
                         const_spec((n_hidden, 1, H_p), lambda i: (0, 0, 0))]
            operands += [params["w_h"], params["b_h"]]
        in_specs += [const_spec((H_p, D_out_p), lambda i: (0, 0)),
                     const_spec((1, D_out_p), lambda i: (0, 0))]
        operands += [params["w_out"], params["b_out"]]

        n_sub = 2 if (TB >= 256 and TB % 16 == 0) else 1
        kernel = functools.partial(_sffnn_resident_kernel, n_hidden, n_sub,
                                   act_dtype)
        out_p = pl.pallas_call(
            kernel,
            out_shape=jax.ShapeDtypeStruct((B_pad, D_out_p), jnp.float32),
            grid=(nt,),
            in_specs=in_specs,
            out_specs=pl.BlockSpec((TB, D_out_p), lambda i: (i, 0)),
            compiler_params=pltpu.CompilerParams(
                dimension_semantics=("parallel",), **cp_kwargs),
            cost_estimate=cost,
        )(*operands)
    else:
        in_specs = [pl.BlockSpec((TB, D_in_p), lambda i, l: (i, 0)),
                    const_spec((D_in_p, H_p), lambda i, l: (0, 0)),
                    const_spec((1, H_p), lambda i, l: (0, 0)),
                    pl.BlockSpec((1, H_p, H_p), lambda i, l: (l, 0, 0)),
                    pl.BlockSpec((1, 1, H_p), lambda i, l: (l, 0, 0)),
                    const_spec((H_p, D_out_p), lambda i, l: (0, 0)),
                    const_spec((1, D_out_p), lambda i, l: (0, 0))]
        operands = [x, params["w_in"], params["b_in"], params["w_h"],
                    params["b_h"], params["w_out"], params["b_out"]]
        kernel = functools.partial(_sffnn_stream_kernel, act_dtype)
        out_p = pl.pallas_call(
            kernel,
            out_shape=jax.ShapeDtypeStruct((B_pad, D_out_p), jnp.float32),
            grid=(nt, n_hidden),
            in_specs=in_specs,
            out_specs=pl.BlockSpec((TB, D_out_p), lambda i, l: (i, 0)),
            scratch_shapes=[pltpu.VMEM((TB, H_p), act_dtype)],
            compiler_params=pltpu.CompilerParams(
                dimension_semantics=("parallel", "arbitrary"), **cp_kwargs),
            cost_estimate=cost,
        )(*operands)

    return out_p[:B, :D_out]


def sffnn_forward(x, w_in, b_in, w_h, b_h, w_out, b_out,
                  weight_dtype=jnp.bfloat16, *, act_dtype=None,
                  stream_hidden=None):
    """One-shot convenience wrapper (pads/casts params on every call; prefer
    prepare_params + sffnn_apply for repeated use)."""
    params = prepare_params(w_in, b_in, w_h, b_h, w_out, b_out,
                            weight_dtype=weight_dtype, act_dtype=act_dtype)
    return sffnn_apply(params, x, stream_hidden=stream_hidden)


# --------------------------------------------------------------------------
# Reference / test harness
# --------------------------------------------------------------------------
def init_params(key, input_dim, hidden_neurons, nlayers, output_dim):
    """Deterministic synthetic parameters (shapes match sffnn.__init__)."""
    ks = jax.random.split(key, 6)
    w_in = jax.random.normal(ks[0], (input_dim, hidden_neurons), jnp.float32) * 0.1
    b_in = jax.random.normal(ks[1], (1, hidden_neurons), jnp.float32) * 0.1
    n_hidden = max(nlayers - 1, 1)
    w_h = jax.random.normal(ks[2], (n_hidden, hidden_neurons, hidden_neurons),
                            jnp.float32) * 0.1
    b_h = jax.random.normal(ks[3], (n_hidden, 1, hidden_neurons), jnp.float32) * 0.1
    if nlayers - 1 == 0:
        w_h, b_h = w_h[:0], b_h[:0]
    w_out = jax.random.normal(ks[4], (hidden_neurons, output_dim), jnp.float32) * 0.1
    b_out = jax.random.normal(ks[5], (1, output_dim), jnp.float32) * 0.1
    return w_in, b_in, w_h, b_h, w_out, b_out


def reference_forward(x, w_in, b_in, w_h, b_h, w_out, b_out):
    h = jnp.maximum(x @ w_in + b_in, 0.0)
    for i in range(w_h.shape[0]):
        h = jnp.maximum(h @ w_h[i] + b_h[i], 0.0)
    return h @ w_out + b_out


if __name__ == "__main__":
    batch, input_dim, hidden_neurons, nlayers, output_dim = 8, 16, 32, 3, 8
    key = jax.random.PRNGKey(0)
    kx, kp = jax.random.split(key)
    x = jax.random.normal(kx, (batch, input_dim), jnp.float32)
    params_raw = init_params(kp, input_dim, hidden_neurons, nlayers, output_dim)
    ref = reference_forward(x, *params_raw)

    # 1) default path: bf16 weights (f32 MXU accumulation), params padded once.
    prep = prepare_params(*params_raw)
    out = jax.block_until_ready(sffnn_apply(prep, x))
    assert out.shape == (batch, output_dim)
    assert jnp.allclose(out, ref, atol=5e-2, rtol=5e-2)

    # 2) f32 weights: bit-faithful within f32 tolerance.
    out_f32 = jax.block_until_ready(
        sffnn_forward(x, *params_raw, weight_dtype=jnp.float32))
    assert jnp.allclose(out_f32, ref, atol=1e-4, rtol=1e-4)

    # 3) nlayers == 1: empty hidden stack (w_h / b_h omitted from the call).
    params1 = init_params(kp, input_dim, hidden_neurons, 1, output_dim)
    out1 = jax.block_until_ready(
        sffnn_forward(x, *params1, weight_dtype=jnp.float32))
    assert jnp.allclose(out1, reference_forward(x, *params1), atol=1e-4, rtol=1e-4)

    # 4) layer-streaming path (auto-selected for large hidden stacks on v7x);
    #    forced here so it is exercised at test shapes.
    out_s = jax.block_until_ready(
        sffnn_forward(x, *params_raw, weight_dtype=jnp.float32,
                      stream_hidden=True))
    assert jnp.allclose(out_s, ref, atol=1e-4, rtol=1e-4)

    # 5) larger batch: exercises TB halving (2 grid steps for the two v7x TCs)
    #    and the 2-sub-tile interleave inside a grid step.
    b2, d2, h2, l2, o2 = 512, 64, 96, 4, 10
    kx2, kp2 = jax.random.split(jax.random.PRNGKey(1))
    x2 = jax.random.normal(kx2, (b2, d2), jnp.float32)
    p2 = init_params(kp2, d2, h2, l2, o2)
    out2 = jax.block_until_ready(
        sffnn_forward(x2, *p2, weight_dtype=jnp.float32))
    assert jnp.allclose(out2, reference_forward(x2, *p2), atol=1e-3, rtol=1e-3)

    print("KERNEL_OK")
</pallas_src>

<mosaic_0001>
module attributes {stable_mosaic.version = 11 : i64} {
  func.func @_sffnn_resident_kernel(%arg0: i32, %arg1: memref<8x128xf32, #tpu.memory_space<vmem>>, %arg2: memref<128x128xbf16, #tpu.memory_space<vmem>>, %arg3: memref<1x128xf32, #tpu.memory_space<vmem>>, %arg4: memref<2x128x128xbf16, #tpu.memory_space<vmem>>, %arg5: memref<2x1x128xf32, #tpu.memory_space<vmem>>, %arg6: memref<128x128xbf16, #tpu.memory_space<vmem>>, %arg7: memref<1x128xf32, #tpu.memory_space<vmem>>, %arg8: memref<8x128xf32, #tpu.memory_space<vmem>>) attributes {dimension_semantics = [#tpu.dimension_semantics<parallel>], iteration_bounds = array<i64: 1>, scalar_prefetch = 0 : i64, scratch_operands = 0 : i64, tpu.core_type = #tpu.core_type<tc>, window_params = [{transform_indices = @transform_0, window_bounds = array<i64: 8, 128>}, {pipeline_mode = #tpu.pipeline_mode<synchronous>, transform_indices = @transform_1, window_bounds = array<i64: 128, 128>}, {pipeline_mode = #tpu.pipeline_mode<synchronous>, transform_indices = @transform_2, window_bounds = array<i64: 1, 128>}, {pipeline_mode = #tpu.pipeline_mode<synchronous>, transform_indices = @transform_3, window_bounds = array<i64: 2, 128, 128>}, {pipeline_mode = #tpu.pipeline_mode<synchronous>, transform_indices = @transform_4, window_bounds = array<i64: 2, 1, 128>}, {pipeline_mode = #tpu.pipeline_mode<synchronous>, transform_indices = @transform_5, window_bounds = array<i64: 128, 128>}, {pipeline_mode = #tpu.pipeline_mode<synchronous>, transform_indices = @transform_6, window_bounds = array<i64: 1, 128>}, {transform_indices = @transform_7, window_bounds = array<i64: 8, 128>}]} {
    %c0 = arith.constant 0 : index
    %c0_0 = arith.constant 0 : index
    %0 = vector.load %arg1[%c0, %c0_0] : memref<8x128xf32, #tpu.memory_space<vmem>>, vector<8x128xf32>
    %1 = arith.truncf %0 : vector<8x128xf32> to vector<8x128xbf16>
    %c0_1 = arith.constant 0 : index
    %c0_2 = arith.constant 0 : index
    %2 = vector.load %arg2[%c0_1, %c0_2] : memref<128x128xbf16, #tpu.memory_space<vmem>>, vector<128x128xbf16>
    %cst = arith.constant dense<0.000000e+00> : vector<8x128xf32>
    %3 = tpu.matmul %1, %2, %cst {dimension_numbers = #tpu.dot_dimension_numbers<[1], [0], [0], [1], [0, 0, 1, 1], [], []>} : vector<8x128xbf16>, vector<128x128xbf16>, vector<8x128xf32> -> vector<8x128xf32>
    %c0_3 = arith.constant 0 : index
    %c0_4 = arith.constant 0 : index
    %4 = vector.load %arg3[%c0_3, %c0_4] : memref<1x128xf32, #tpu.memory_space<vmem>>, vector<1x128xf32>
    %5 = vector.broadcast %4 : vector<1x128xf32> to vector<8x128xf32>
    %6 = arith.addf %3, %5 : vector<8x128xf32>
    %cst_5 = arith.constant 0.000000e+00 : f32
    %7 = vector.broadcast %cst_5 : f32 to vector<8x128xf32>
    %8 = arith.maximumf %6, %7 : vector<8x128xf32>
    %9 = arith.truncf %8 : vector<8x128xf32> to vector<8x128xbf16>
    %c0_6 = arith.constant 0 : index
    %c0_7 = arith.constant 0 : index
    %c0_8 = arith.constant 0 : index
    %10 = vector.load %arg4[%c0_6, %c0_7, %c0_8] : memref<2x128x128xbf16, #tpu.memory_space<vmem>>, vector<1x128x128xbf16>
    %11 = vector.shape_cast %10 : vector<1x128x128xbf16> to vector<128x128xbf16>
    %cst_9 = arith.constant dense<0.000000e+00> : vector<8x128xf32>
    %12 = tpu.matmul %9, %11, %cst_9 {dimension_numbers = #tpu.dot_dimension_numbers<[1], [0], [0], [1], [0, 0, 1, 1], [], []>} : vector<8x128xbf16>, vector<128x128xbf16>, vector<8x128xf32> -> vector<8x128xf32>
    %c0_10 = arith.constant 0 : index
    %c0_11 = arith.constant 0 : index
    %c0_12 = arith.constant 0 : index
    %13 = vector.load %arg5[%c0_10, %c0_11, %c0_12] : memref<2x1x128xf32, #tpu.memory_space<vmem>>, vector<1x1x128xf32>
    %14 = vector.shape_cast %13 : vector<1x1x128xf32> to vector<1x128xf32>
    %15 = vector.broadcast %14 : vector<1x128xf32> to vector<8x128xf32>
    %16 = arith.addf %12, %15 : vector<8x128xf32>
    %cst_13 = arith.constant 0.000000e+00 : f32
    %17 = vector.broadcast %cst_13 : f32 to vector<8x128xf32>
    %18 = arith.maximumf %16, %17 : vector<8x128xf32>
    %19 = arith.truncf %18 : vector<8x128xf32> to vector<8x128xbf16>
    %c1 = arith.constant 1 : index
    %c0_14 = arith.constant 0 : index
    %c0_15 = arith.constant 0 : index
    %20 = vector.load %arg4[%c1, %c0_14, %c0_15] : memref<2x128x128xbf16, #tpu.memory_space<vmem>>, vector<1x128x128xbf16>
    %21 = vector.shape_cast %20 : vector<1x128x128xbf16> to vector<128x128xbf16>
    %cst_16 = arith.constant dense<0.000000e+00> : vector<8x128xf32>
    %22 = tpu.matmul %19, %21, %cst_16 {dimension_numbers = #tpu.dot_dimension_numbers<[1], [0], [0], [1], [0, 0, 1, 1], [], []>} : vector<8x128xbf16>, vector<128x128xbf16>, vector<8x128xf32> -> vector<8x128xf32>
    %c1_17 = arith.constant 1 : index
    %c0_18 = arith.constant 0 : index
    %c0_19 = arith.constant 0 : index
    %23 = vector.load %arg5[%c1_17, %c0_18, %c0_19] : memref<2x1x128xf32, #tpu.memory_space<vmem>>, vector<1x1x128xf32>
    %24 = vector.shape_cast %23 : vector<1x1x128xf32> to vector<1x128xf32>
    %25 = vector.broadcast %24 : vector<1x128xf32> to vector<8x128xf32>
    %26 = arith.addf %22, %25 : vector<8x128xf32>
    %cst_20 = arith.constant 0.000000e+00 : f32
    %27 = vector.broadcast %cst_20 : f32 to vector<8x128xf32>
    %28 = arith.maximumf %26, %27 : vector<8x128xf32>
    %29 = arith.truncf %28 : vector<8x128xf32> to vector<8x128xbf16>
    %c0_21 = arith.constant 0 : index
    %c0_22 = arith.constant 0 : index
    %30 = vector.load %arg6[%c0_21, %c0_22] : memref<128x128xbf16, #tpu.memory_space<vmem>>, vector<128x128xbf16>
    %cst_23 = arith.constant dense<0.000000e+00> : vector<8x128xf32>
    %31 = tpu.matmul %29, %30, %cst_23 {dimension_numbers = #tpu.dot_dimension_numbers<[1], [0], [0], [1], [0, 0, 1, 1], [], []>} : vector<8x128xbf16>, vector<128x128xbf16>, vector<8x128xf32> -> vector<8x128xf32>
    %c0_24 = arith.constant 0 : index
    %c0_25 = arith.constant 0 : index
    %32 = vector.load %arg7[%c0_24, %c0_25] : memref<1x128xf32, #tpu.memory_space<vmem>>, vector<1x128xf32>
    %33 = vector.broadcast %32 : vector<1x128xf32> to vector<8x128xf32>
    %34 = arith.addf %31, %33 : vector<8x128xf32>
    %c0_26 = arith.constant 0 : index
    %c0_27 = arith.constant 0 : index
    %35 = vector.load %arg8[%c0_26, %c0_27] : memref<8x128xf32, #tpu.memory_space<vmem>>, vector<8x128xf32>
    tpu.vector_store %arg8[%c0_26, %c0_27], %34 {strides = array<i32>} : memref<8x128xf32, #tpu.memory_space<vmem>>, vector<8x128xf32>,
    return
  }
  func.func @transform_0(%arg0: i32) -> (i32, i32) {
    %c0_i32 = arith.constant 0 : i32
    %c0_i32_0 = arith.constant 0 : i32
    return %arg0, %c0_i32 : i32, i32
  }
  func.func @transform_1(%arg0: i32) -> (i32, i32) {
    %c0_i32 = arith.constant 0 : i32
    %c0_i32_0 = arith.constant 0 : i32
    %c0_i32_1 = arith.constant 0 : i32
    return %c0_i32, %c0_i32_0 : i32, i32
  }
  func.func @transform_2(%arg0: i32) -> (i32, i32) {
    %c0_i32 = arith.constant 0 : i32
    %c0_i32_0 = arith.constant 0 : i32
    %c0_i32_1 = arith.constant 0 : i32
    return %c0_i32, %c0_i32_0 : i32, i32
  }
  func.func @transform_3(%arg0: i32) -> (i32, i32, i32) {
    %c0_i32 = arith.constant 0 : i32
    %c0_i32_0 = arith.constant 0 : i32
    %c0_i32_1 = arith.constant 0 : i32
    %c0_i32_2 = arith.constant 0 : i32
    return %c0_i32, %c0_i32_0, %c0_i32_1 : i32, i32, i32
  }
  func.func @transform_4(%arg0: i32) -> (i32, i32, i32) {
    %c0_i32 = arith.constant 0 : i32
    %c0_i32_0 = arith.constant 0 : i32
    %c0_i32_1 = arith.constant 0 : i32
    %c0_i32_2 = arith.constant 0 : i32
    return %c0_i32, %c0_i32_0, %c0_i32_1 : i32, i32, i32
  }
  func.func @transform_5(%arg0: i32) -> (i32, i32) {
    %c0_i32 = arith.constant 0 : i32
    %c0_i32_0 = arith.constant 0 : i32
    %c0_i32_1 = arith.constant 0 : i32
    return %c0_i32, %c0_i32_0 : i32, i32
  }
  func.func @transform_6(%arg0: i32) -> (i32, i32) {
    %c0_i32 = arith.constant 0 : i32
    %c0_i32_0 = arith.constant 0 : i32
    %c0_i32_1 = arith.constant 0 : i32
    return %c0_i32, %c0_i32_0 : i32, i32
  }
  func.func @transform_7(%arg0: i32) -> (i32, i32) {
    %c0_i32 = arith.constant 0 : i32
    %c0_i32_0 = arith.constant 0 : i32
    return %arg0, %c0_i32 : i32, i32
  }
}

</mosaic_0001>

<bundles_post_ra>
// kernel: tpu_custom_call.1
= control target key start
LH: loop header
LB: loop body
LE: loop exit
PB: predicated region body
PF: predicated region fallthrough
CT: control target
= control target key end

     0   :  { %12 = vsyncpa [#allocation3], 0  ;;  %s980_s0 = inlined_call_operand.hbm [shape: f32[8,128], index: 0, kind: input, shape index: {}]   ;;  %s981_s1 = inlined_call_operand.hbm [shape: bf16[128,128], index: 1, kind: input, shape index: {}]   ;;  %s982_s2 = inlined_call_operand.vmem [shape: f32[1,128], index: 2, kind: input, shape index: {}]   ;;  %s983_s3 = inlined_call_operand.hbm [shape: bf16[2,128,128], index: 3, kind: input, shape index: {}]   ;;  %s984_s4 = inlined_call_operand.vmem [shape: f32[2,1,128], index: 4, kind: input, shape index: {}]   ;;  %s985_s5 = inlined_call_operand.hbm [shape: bf16[128,128], index: 5, kind: input, shape index: {}]   ;;  %s986_s6 = inlined_call_operand.vmem [shape: f32[1,128], index: 6, kind: input, shape index: {}]   ;;  %s987_s7 = inlined_call_operand.hbm [shape: f32[8,128], index: 7, kind: output, shape index: {}]  }
   0x1   :  { %13 = vsyncpa [#allocation6], 0 }
   0x2   :  { %14 = vsyncpa [#allocation9], 0 }
   0x3   :  { %15 = vsyncpa [#allocation4], 0  ;;  %s855_s24 = smov [#allocation5]  }
   0x4   :  { %s31_s25 = sshll.u32 %s855_s24, 4  ;;  %s32_s25 = int_to_ptr.vmem [resolvable:$true] %s31_s25 }
   0x5   :  { %s755_s26 = scalar_lea.vmem %s32_s25, 1024  ;;  %p760_p1 = scmp.lt.s32.totalorder %s32_s25, %s32_s25 }
   0x6   :  { %p756_p0 = scmp.ne.s32.totalorder %s32_s25, %s755_s26  ;;  %p761_p2 = scmp.lt.s32.totalorder %s755_s26, %s755_s26 }
   0x8   :  { %p762_p3 = por %p761_p2, %p760_p1 }
   0xa   :  { %p763_p4 = pnand %p762_p3, %p756_p0 }
   0xc   :  { %766 = shalt.err (!%p763_p4)
}
   0xd   :  { %s856_s27 = smov 64   ;;  %s857_s28 = smov 4  }
   0xe   :  { %37 = dma.hbm_to_vmem [thread:$0]  %s981_s1, 1024, %s32_s25, [#allocation6], %s856_s27, %s856_s27, %s857_s28  }
   0xf   :  { %s858_s8 = smov [#allocation2]   ;;  %s859_s10 = smov [#allocation7]  }
  0x10   :  { %s22_s9 = sshll.u32 %s858_s8, 4  ;;  %s45_s11 = sshll.u32 %s859_s10, 4  ;;  %s23_s9 = int_to_ptr.vmem [resolvable:$true] %s22_s9  ;;  %s46_s11 = int_to_ptr.vmem [resolvable:$true] %s45_s11 }
  0x11   :  { %s775_s12 = scalar_lea.vmem %s23_s9, 128  ;;  %p780_p6 = scmp.lt.s32.totalorder %s23_s9, %s23_s9 }
  0x12   :  { %p776_p5 = scmp.ne.s32.totalorder %s23_s9, %s775_s12  ;;  %p781_p7 = scmp.lt.s32.totalorder %s775_s12, %s775_s12 }
  0x14   :  { %p782_p8 = por %p781_p7, %p780_p6 }
  0x16   :  { %p783_p9 = pnand %p782_p8, %p776_p5 }
  0x18   :  { %786 = shalt.err (!%p783_p9)
}
  0x19   :  { %25 = dma.hbm_to_vmem [thread:$0]  %s980_s0, 128, %s23_s9, [#allocation3]  }
  0x1a   :  { %s795_s15 = scalar_lea.vmem %s46_s11, 2048  ;;  %p800_p11 = scmp.lt.s32.totalorder %s46_s11, %s46_s11 }
  0x1b   :  { %p796_p10 = scmp.ne.s32.totalorder %s46_s11, %s795_s15  ;;  %p801_p12 = scmp.lt.s32.totalorder %s795_s15, %s795_s15 }
  0x1d   :  { %p802_p13 = por %p801_p12, %p800_p11 }
  0x1f   :  { %p803_p0 = pnand %p802_p13, %p796_p10 }
  0x21   :  { %806 = shalt.err (!%p803_p0)
}
  0x22   :  { %51 = dma.hbm_to_vmem [thread:$0]  %s983_s3, 2048, %s46_s11, [#allocation6], %s856_s27, %s856_s27, %s857_s28  }
  0x23   :  { %s860_s17 = smov [#allocation8]  }
  0x24   :  { %s59_s18 = sshll.u32 %s860_s17, 4  ;;  %s60_s18 = int_to_ptr.vmem [resolvable:$true] %s59_s18 }
  0x25   :  { %s815_s19 = scalar_lea.vmem %s60_s18, 1024  ;;  %p820_p2 = scmp.lt.s32.totalorder %s60_s18, %s60_s18 }
  0x26   :  { %p816_p1 = scmp.ne.s32.totalorder %s60_s18, %s815_s19  ;;  %p821_p3 = scmp.lt.s32.totalorder %s815_s19, %s815_s19 }
  0x28   :  { %p822_p4 = por %p821_p3, %p820_p2 }
  0x2a   :  { %p823_p5 = pnand %p822_p4, %p816_p1 }
  0x2c   :  { %826 = shalt.err (!%p823_p5)
}
  0x2d   :  { %65 = dma.hbm_to_vmem [thread:$0]  %s985_s5, 1024, %s60_s18, [#allocation9], %s856_s27, %s856_s27, %s857_s28  }
  0x2e   :  { %847 = dma.done.wait [#allocation3], 128  }
  0x2f   :  { %848 = vsyncadd [#allocation3], 4294967168 }
  0x30   :  { %849 = dma.done.wait [#allocation6], 3072  }
  0x31   :  { %850 = vsyncadd [#allocation6], 4294964224 }
  0x32   :  { %851 = dma.done.wait [#allocation9], 1024  }
  0x33   :  { %852 = vsyncadd [#allocation9], 4294966272  ;;  %v861_v0 = vmov 0.0   ;;  %vm862_vm0 = vmmov 0   ;;  %v715_v1 = vld [vmem:[#allocation5 + $0x38] sm:$0xff]   ;;  %v716_v2 = vld [vmem:[#allocation5 + $0x30] sm:$0xff]  }
  0x34   :  { %626 = vmatprep.subr.bf16.mxu0 %v861_v0  ;;  %642 = vmatprep.mubr.msk.bf16.mxu0 %vm862_vm0, %v861_v0  ;;  %v717_v3 = vld [vmem:[#allocation5 + $0x28] sm:$0xff]   ;;  %v723_v4 = vld [vmem:[#allocation7 + $0x38] sm:$0xff]   ;;  %v718_v5 = vld [vmem:[#allocation5 + $0x20] sm:$0xff]   ;;  %s863_s26 = smov [#allocation10]  }
  0x35   :  { %646 = vmatprep.subr.bf16.mxu1 %v861_v0  ;;  %662 = vmatprep.mubr.msk.bf16.mxu1 %vm862_vm0, %v861_v0  ;;  %v724_v6 = vld [vmem:[#allocation7 + $0x30] sm:$0xff]   ;;  %v719_v7 = vld [vmem:[#allocation5 + $0x18] sm:$0xff]   ;;  %v725_v8 = vld [vmem:[#allocation7 + $0x28] sm:$0xff]   ;;  %s542_s27 = sshll.u32 %s863_s26, 4  ;;  %s543_s27 = int_to_ptr.vmem [resolvable:$true] %s542_s27 }
  0x36   :  { %627 = vmatpush3.bf16.msra.mxu0 %v715_v1  ;;  %647 = vmatpush3.bf16.msra.mxu1 %v723_v4  ;;  %v720_v9 = vld [vmem:[#allocation5 + $0x10] sm:$0xff]   ;;  %v726_v10 = vld [vmem:[#allocation7 + $0x20] sm:$0xff]   ;;  %v721_v11 = vld [vmem:[#allocation5 + $0x8] sm:$0xff]   ;;  %p832_p7 = scmp.lt.s32.totalorder %s543_s27, %s543_s27 }
  0x37   :  { %628 = vmatprep.subr.bf16.mxu0 %v861_v0  ;;  %648 = vmatprep.subr.bf16.mxu1 %v861_v0  ;;  %v727_v12 = vld [vmem:[#allocation7 + $0x18] sm:$0xff]   ;;  %v722_v13 = vld [vmem:[#allocation5] sm:$0xff]   ;;  %v728_v15 = vld [vmem:[#allocation7 + $0x10] sm:$0xff]  }
  0x38   :  { %v81_v14 = vld [vmem:[#allocation2] sm:$0xff]  ;;  %v729_v17 = vld [vmem:[#allocation7 + $0x8] sm:$0xff]   ;;  %v730_v18 = vld [vmem:[#allocation7] sm:$0xff]  }
  0x39   :  { %v82_v16 = vpack.c.bf16 %v81_v14, %v81_v14  ;;  %v731_v19 = vld [vmem:[#allocation7 + $0x78] sm:$0xff]   ;;  %v732_v20 = vld [vmem:[#allocation7 + $0x70] sm:$0xff]   ;;  %v733_v21 = vld [vmem:[#allocation7 + $0x68] sm:$0xff]  }
  0x3a   :  { %629 = vmatpush3.bf16.msra.mxu0 %v716_v2  ;;  %649 = vmatpush3.bf16.msra.mxu1 %v724_v6  ;;  %v734_v22 = vld [vmem:[#allocation7 + $0x60] sm:$0xff]   ;;  %v735_v23 = vld [vmem:[#allocation7 + $0x58] sm:$0xff]   ;;  %v736_v24 = vld [vmem:[#allocation7 + $0x50] sm:$0xff]  }
  0x3b   :  { %630 = vmatprep.subr.bf16.mxu0 %v861_v0  ;;  %650 = vmatprep.subr.bf16.mxu1 %v861_v0  ;;  %v553_v25 = vld [vmem:[%s982_s2] ss:$0 sm:$0xff]  ;;  %v737_v33 = vld [vmem:[#allocation7 + $0x48] sm:$0xff]   ;;  %v738_v34 = vld [vmem:[#allocation7 + $0x40] sm:$0xff]  }
  0x3c   :  { %v739_v35 = vld [vmem:[#allocation8 + $0x38] sm:$0xff]   ;;  %v740_v36 = vld [vmem:[#allocation8 + $0x30] sm:$0xff]   ;;  %v741_v37 = vld [vmem:[#allocation8 + $0x28] sm:$0xff]  }
  0x3d   :  { %v742_v38 = vld [vmem:[#allocation8 + $0x20] sm:$0xff]   ;;  %v743_v39 = vld [vmem:[#allocation8 + $0x18] sm:$0xff]   ;;  %v744_v40 = vld [vmem:[#allocation8 + $0x10] sm:$0xff]  }
  0x3e   :  { %631 = vmatpush3.bf16.msra.mxu0 %v717_v3  ;;  %651 = vmatpush3.bf16.msra.mxu1 %v725_v8  ;;  %v562_v41 = vld [vmem:[%s984_s4] ss:$0 sm:$0xff]  ;;  %v745_v49 = vld [vmem:[#allocation8 + $0x8] sm:$0xff]   ;;  %v746_v50 = vld [vmem:[#allocation8] sm:$0xff]  }
  0x3f   :  { %632 = vmatprep.subr.bf16.mxu0 %v861_v0  ;;  %652 = vmatprep.subr.bf16.mxu1 %v861_v0  ;;  %v572_v51 = vld [vmem:[%s984_s4 + $0x1] ss:$0 sm:$0xff]  ;;  %v581_v59 = vld [vmem:[%s986_s6] ss:$0 sm:$0xff]  ;;  %s827_s4 = scalar_lea.vmem %s543_s27, 128 }
  0x40   :  { %p828_p6 = scmp.ne.s32.totalorder %s543_s27, %s827_s4  ;;  %p833_p8 = scmp.lt.s32.totalorder %s827_s4, %s827_s4 }
  0x42   :  { %633 = vmatpush3.bf16.msra.mxu0 %v718_v5  ;;  %653 = vmatpush3.bf16.msra.mxu1 %v726_v10  ;;  %p834_p9 = por %p833_p8, %p832_p7 }
  0x43   :  { %634 = vmatprep.subr.bf16.mxu0 %v861_v0  ;;  %654 = vmatprep.subr.bf16.mxu1 %v861_v0 }
  0x44   :  { %p835_p10 = pnand %p834_p9, %p828_p6 }
  0x46   :  { %635 = vmatpush3.bf16.msra.mxu0 %v719_v7  ;;  %655 = vmatpush3.bf16.msra.mxu1 %v727_v12 }
  0x47   :  { %636 = vmatprep.subr.bf16.mxu0 %v861_v0  ;;  %656 = vmatprep.subr.bf16.mxu1 %v861_v0 }
  0x4a   :  { %637 = vmatpush3.bf16.msra.mxu0 %v720_v9  ;;  %657 = vmatpush3.bf16.msra.mxu1 %v728_v15 }
  0x4b   :  { %638 = vmatprep.subr.bf16.mxu0 %v861_v0  ;;  %658 = vmatprep.subr.bf16.mxu1 %v861_v0 }
  0x4e   :  { %639 = vmatpush3.bf16.msra.mxu0 %v721_v11  ;;  %659 = vmatpush3.bf16.msra.mxu1 %v729_v17 }
  0x4f   :  { %640 = vmatprep.subr.bf16.mxu0 %v861_v0  ;;  %660 = vmatprep.subr.bf16.mxu1 %v861_v0 }
  0x52   :  { %641 = vmatpush3.bf16.msra.mxu0 %v722_v13  ;;  %661 = vmatpush3.bf16.msra.mxu1 %v730_v18 }
  0x53   :  { %666 = vmatprep.subr.bf16.mxu0 %v861_v0  ;;  %686 = vmatprep.subr.bf16.mxu1 %v861_v0 }
  0x55   :  { %643 = vmatmul.mubr.bf16.vlgmr.msra.gmra.mxu0 %v82_v16 }
  0x56   :  { %682 = vmatprep.mubr.msk.bf16.mxu0 %vm862_vm0, %v861_v0  ;;  %667 = vmatpush3.bf16.msra.mxu0 %v731_v19 }
  0x57   :  { %668 = vmatprep.subr.bf16.mxu0 %v861_v0 }
  0x5a   :  { %669 = vmatpush3.bf16.msra.mxu0 %v732_v20 }
  0x5b   :  { %670 = vmatprep.subr.bf16.mxu0 %v861_v0 }
  0x5e   :  { %671 = vmatpush3.bf16.msra.mxu0 %v733_v21 }
  0x5f   :  { %672 = vmatprep.subr.bf16.mxu0 %v861_v0 }
  0x62   :  { %673 = vmatpush3.bf16.msra.mxu0 %v734_v22 }
  0x63   :  { %674 = vmatprep.subr.bf16.mxu0 %v861_v0 }
  0x66   :  { %675 = vmatpush3.bf16.msra.mxu0 %v735_v23 }
  0x67   :  { %676 = vmatprep.subr.bf16.mxu0 %v861_v0 }
  0x6a   :  { %677 = vmatpush3.bf16.msra.mxu0 %v736_v24 }
  0x6b   :  { %678 = vmatprep.subr.bf16.mxu0 %v861_v0 }
  0x6e   :  { %679 = vmatpush3.bf16.msra.mxu0 %v737_v33 }
  0x6f   :  { %680 = vmatprep.subr.bf16.mxu0 %v861_v0 }
  0x72   :  { %681 = vmatpush3.bf16.msra.mxu0 %v738_v34 }
 0x115   :  { %v188_v26 = vpop.f32.mrf.mxu0 }
 0x116   :  { %v189_v27 = vadd.f32 %v553_v25, %v188_v26 }
 0x117   :  { %v644_v28 = vpop.f32.mrf.mxu0 }
 0x118   :  { %v194_v29 = vmax.f32 %v189_v27, 0.0 }
 0x119   :  { %v191_v30 = vpop.f32.mrf.mxu0 }
 0x11a   :  { %v195_v31 = vpack.c.bf16 %v194_v29, %v194_v29 }
 0x11b   :  { %v645_v32 = vpop.f32.mrf.mxu0 }
 0x11c   :  { %663 = vmatmul.mubr.bf16.vlgmr.msra.gmra.mxu1 %v195_v31 }
 0x11d   :  { %702 = vmatprep.mubr.msk.bf16.mxu1 %vm862_vm0, %v861_v0  ;;  %687 = vmatpush3.bf16.msra.mxu1 %v739_v35 }
 0x11e   :  { %688 = vmatprep.subr.bf16.mxu1 %v861_v0 }
 0x121   :  { %689 = vmatpush3.bf16.msra.mxu1 %v740_v36 }
 0x122   :  { %690 = vmatprep.subr.bf16.mxu1 %v861_v0 }
 0x125   :  { %691 = vmatpush3.bf16.msra.mxu1 %v741_v37 }
 0x126   :  { %692 = vmatprep.subr.bf16.mxu1 %v861_v0 }
 0x129   :  { %693 = vmatpush3.bf16.msra.mxu1 %v742_v38 }
 0x12a   :  { %694 = vmatprep.subr.bf16.mxu1 %v861_v0 }
 0x12d   :  { %695 = vmatpush3.bf16.msra.mxu1 %v743_v39 }
 0x12e   :  { %696 = vmatprep.subr.bf16.mxu1 %v861_v0 }
 0x131   :  { %697 = vmatpush3.bf16.msra.mxu1 %v744_v40 }
 0x132   :  { %698 = vmatprep.subr.bf16.mxu1 %v861_v0 }
 0x135   :  { %699 = vmatpush3.bf16.msra.mxu1 %v745_v49 }
 0x136   :  { %700 = vmatprep.subr.bf16.mxu1 %v861_v0 }
 0x139   :  { %701 = vmatpush3.bf16.msra.mxu1 %v746_v50 }
 0x1dc   :  { %v301_v42 = vpop.f32.mrf.mxu1 }
 0x1dd   :  { %v302_v43 = vadd.f32 %v562_v41, %v301_v42 }
 0x1de   :  { %v664_v44 = vpop.f32.mrf.mxu1 }
 0x1df   :  { %v307_v45 = vmax.f32 %v302_v43, 0.0 }
 0x1e0   :  { %v304_v46 = vpop.f32.mrf.mxu1 }
 0x1e1   :  { %v308_v47 = vpack.c.bf16 %v307_v45, %v307_v45 }
 0x1e2   :  { %v665_v48 = vpop.f32.mrf.mxu1 }
 0x1e3   :  { %683 = vmatmul.mubr.bf16.vlgmr.msra.gmra.mxu0 %v308_v47 }
 0x2a3   :  { %v416_v52 = vpop.f32.mrf.mxu0 }
 0x2a4   :  { %v417_v53 = vadd.f32 %v572_v51, %v416_v52 }
 0x2a5   :  { %v684_v54 = vpop.f32.mrf.mxu0 }
 0x2a6   :  { %v422_v55 = vmax.f32 %v417_v53, 0.0 }
 0x2a7   :  { %v419_v56 = vpop.f32.mrf.mxu0 }
 0x2a8   :  { %v423_v57 = vpack.c.bf16 %v422_v55, %v422_v55 }
 0x2a9   :  { %v685_v58 = vpop.f32.mrf.mxu0 }
 0x2aa   :  { %703 = vmatmul.mubr.bf16.vlgmr.msra.gmra.mxu1 %v423_v57 }
 0x36a   :  { %v529_v60 = vpop.f32.mrf.mxu1 }
 0x36b   :  { %v530_v61 = vadd.f32 %v581_v59, %v529_v60 }
 0x36c   :  { %v704_v62 = vpop.f32.mrf.mxu1 }
 0x36d   :  { %535 = vst [vmem:[#allocation10] sm:$0xff] %v530_v61 }
 0x36e   :  { %v532_v63 = vpop.f32.mrf.mxu1 }
 0x36f   :  { %838 = shalt.err (!%p835_p10)
}
 0x370   :  { %545 = dma.vmem_to_hbm [thread:$0]  %s543_s27, 128, %s987_s7, [#allocation4]   ;;  %v705_v0 = vpop.f32.mrf.mxu1 }
 0x371   :  { %853 = dma.done.wait [#allocation4], 128  }
 0x372   :  { %854 = vsyncadd [#allocation4], 4294967168 }
 0x373   :  { %549 = vsyncpa [#allocation3], 1 }
 0x374   :  { %550 = vsyncpa [#allocation6], 1 }
 0x375   :  { %551 = vsyncpa [#allocation9], 1 }
 0x376   :  { %552 = vsyncpa [#allocation4], 1 }

</bundles_post_ra>
